<compile_context>
chip_gen: v7x
topology: tpu7x:2x2x1
jax: 0.10.0
libtpu: 0.0.40
codegen_flags: <defaults>
</compile_context>

<pallas_src>
import functools
import math

import jax
import jax.numpy as jnp
from jax.experimental import pallas as pl
from jax.experimental.pallas import tpu as pltpu


# ----------------------------------------------------------------------------
# Kernel 1: fused Q/K/V projection   (x @ Wq_t + bq, x @ Wk_t + bk, x @ Wv_t + bv)
# ----------------------------------------------------------------------------
def _qkv_proj_kernel(x_ref, wq_ref, wk_ref, wv_ref, bq_ref, bk_ref, bv_ref,
                     q_ref, k_ref, v_ref):
    x = x_ref[...]                                    # (TM, H)
    q = jnp.dot(x, wq_ref[...], preferred_element_type=jnp.float32) + bq_ref[...]
    k = jnp.dot(x, wk_ref[...], preferred_element_type=jnp.float32) + bk_ref[...]
    v = jnp.dot(x, wv_ref[...], preferred_element_type=jnp.float32) + bv_ref[...]
    q_ref[...] = q.astype(q_ref.dtype)
    k_ref[...] = k.astype(k_ref.dtype)
    v_ref[...] = v.astype(v_ref.dtype)


# ----------------------------------------------------------------------------
# Kernel 2: per-(batch, head) scaled dot-product attention
# ----------------------------------------------------------------------------
def _attention_kernel(q_ref, k_ref, v_ref, mask_ref, o_ref, *, scale):
    q = q_ref[0, 0]                                   # (S, hd)
    k = k_ref[0, 0]                                   # (S, hd)
    v = v_ref[0, 0]                                   # (S, hd)

    # scores = (Q @ K^T) / sqrt(hd) -- contract over head_dim, no transpose.
    scores = jax.lax.dot_general(
        q, k,
        dimension_numbers=(((1,), (1,)), ((), ())),
        preferred_element_type=jnp.float32,
    ) * scale                                         # (S, S) f32

    scores = scores + mask_ref[0]                     # (1, S) additive mask, bcast over queries

    # Numerically stable softmax in f32.
    m = jnp.max(scores, axis=-1, keepdims=True)
    e = jnp.exp(scores - m)
    denom = jnp.sum(e, axis=-1, keepdims=True)
    probs = e / denom

    ctx = jnp.dot(probs.astype(v.dtype), v, preferred_element_type=jnp.float32)
    o_ref[0, 0] = ctx.astype(o_ref.dtype)             # (S, hd)


# ----------------------------------------------------------------------------
# Wrapper
# ----------------------------------------------------------------------------
def _pick_row_tile(m):
    for t in (512, 256, 128):
        if m % t == 0:
            return t
    return m


def vanilla_bert_self_attention(hidden_states, wq, bq, wk, bk, wv, bv,
                                num_attention_heads, attention_mask=None):
    """hidden_states: (B, S, H); weights: (H, H) PyTorch [out, in]; biases: (H,).

    attention_mask (optional): additive mask broadcastable to (B, S) over keys,
    e.g. the usual HuggingFace (B, 1, 1, S) 0 / -1e9 mask.
    """
    B, S, H = hidden_states.shape
    nh = num_attention_heads
    hd = H // nh
    dtype = hidden_states.dtype
    M = B * S

    # ---- Q/K/V projection -------------------------------------------------
    x2d = hidden_states.reshape(M, H)
    wq_t, wk_t, wv_t = wq.T, wk.T, wv.T               # (H_in, H_out) layout
    bq2, bk2, bv2 = (b.reshape(1, H) for b in (bq, bk, bv))

    TM = _pick_row_tile(M)
    row_spec = pl.BlockSpec((TM, H), lambda i: (i, 0))
    w_spec = pl.BlockSpec((H, H), lambda i: (0, 0))
    b_spec = pl.BlockSpec((1, H), lambda i: (0, 0))

    q2d, k2d, v2d = pl.pallas_call(
        _qkv_proj_kernel,
        out_shape=(jax.ShapeDtypeStruct((M, H), dtype),) * 3,
        grid_spec=pl.GridSpec(
            grid=(M // TM,),
            in_specs=[row_spec, w_spec, w_spec, w_spec, b_spec, b_spec, b_spec],
            out_specs=[row_spec, row_spec, row_spec],
        ),
        compiler_params=pltpu.CompilerParams(
            dimension_semantics=("parallel",)),
    )(x2d, wq_t, wk_t, wv_t, bq2, bk2, bv2)

    # ---- split heads (layout plumbing in the wrapper) ----------------------
    def split_heads(x):
        return x.reshape(B, S, nh, hd).transpose(0, 2, 1, 3)   # (B, nh, S, hd)

    q4, k4, v4 = split_heads(q2d), split_heads(k2d), split_heads(v2d)

    if attention_mask is None:
        mask = jnp.zeros((B, 1, S), dtype=jnp.float32)
    else:
        mask = jnp.asarray(attention_mask, dtype=jnp.float32).reshape(B, 1, S)

    # ---- attention ---------------------------------------------------------
    scale = 1.0 / math.sqrt(hd)
    qkv_spec = pl.BlockSpec((1, 1, S, hd), lambda b, h: (b, h, 0, 0))
    mask_spec = pl.BlockSpec((1, 1, S), lambda b, h: (b, 0, 0))

    ctx = pl.pallas_call(
        functools.partial(_attention_kernel, scale=scale),
        out_shape=jax.ShapeDtypeStruct((B, nh, S, hd), dtype),
        grid_spec=pl.GridSpec(
            grid=(B, nh),
            in_specs=[qkv_spec, qkv_spec, qkv_spec, mask_spec],
            out_specs=qkv_spec,
        ),
        compiler_params=pltpu.CompilerParams(
            dimension_semantics=("parallel", "parallel")),
    )(q4, k4, v4, mask)

    # (B, nh, S, hd) -> (B, S, H): same permute + view as the PyTorch module.
    return ctx.transpose(0, 2, 1, 3).reshape(B, S, H)


# ----------------------------------------------------------------------------
# Pure-JAX reference matching the PyTorch forward exactly (dropout in eval).
# ----------------------------------------------------------------------------
def vanilla_bert_self_attention_ref(hidden_states, wq, bq, wk, bk, wv, bv,
                                    num_attention_heads, attention_mask=None):
    B, S, H = hidden_states.shape
    nh = num_attention_heads
    hd = H // nh

    def proj(w, b):
        return hidden_states @ w.T + b

    def split(x):
        return x.reshape(B, S, nh, hd).transpose(0, 2, 1, 3)

    q, k, v = split(proj(wq, bq)), split(proj(wk, bk)), split(proj(wv, bv))
    scores = jnp.einsum("bhqd,bhkd->bhqk", q, k) / math.sqrt(hd)
    if attention_mask is not None:
        scores = scores + attention_mask
    probs = jax.nn.softmax(scores, axis=-1)
    ctx = jnp.einsum("bhqk,bhkd->bhqd", probs, v)
    return ctx.transpose(0, 2, 1, 3).reshape(B, S, H)


if __name__ == "__main__":
    B, S, H, NH = 2, 8, 32, 4
    key = jax.random.PRNGKey(0)
    k_hs, k_wq, k_bq, k_wk, k_bk, k_wv, k_bv = jax.random.split(key, 7)

    hidden_states = jax.random.normal(k_hs, (B, S, H), dtype=jnp.float32)

    bound = 1.0 / math.sqrt(H)
    def lin(kw, kb):
        w = jax.random.uniform(kw, (H, H), minval=-bound, maxval=bound,
                               dtype=jnp.float32)
        b = jax.random.uniform(kb, (H,), minval=-bound, maxval=bound,
                               dtype=jnp.float32)
        return w, b

    wq, bq = lin(k_wq, k_bq)
    wk, bk = lin(k_wk, k_bk)
    wv, bv = lin(k_wv, k_bv)

    # HuggingFace-style additive mask (B, 1, 1, S): mask out last 2 keys of
    # the second batch element.
    mask = jnp.zeros((B, 1, 1, S), dtype=jnp.float32)
    mask = mask.at[1, :, :, -2:].set(-1e9)

    out = vanilla_bert_self_attention(hidden_states, wq, bq, wk, bk, wv, bv,
                                      NH, attention_mask=mask)
    out = jax.block_until_ready(out)

    ref = vanilla_bert_self_attention_ref(hidden_states, wq, bq, wk, bk, wv, bv,
                                          NH, attention_mask=mask)
    assert out.shape == (B, S, H)
    assert jnp.allclose(out, ref, atol=1e-5, rtol=1e-5)

    print("KERNEL_OK")
</pallas_src>

<mosaic_0001>
module attributes {stable_mosaic.version = 11 : i64} {
  func.func @_qkv_proj_kernel(%arg0: i32, %arg1: memref<16x32xf32, #tpu.memory_space<vmem>>, %arg2: memref<32x32xf32, #tpu.memory_space<vmem>>, %arg3: memref<32x32xf32, #tpu.memory_space<vmem>>, %arg4: memref<32x32xf32, #tpu.memory_space<vmem>>, %arg5: memref<1x32xf32, #tpu.memory_space<vmem>>, %arg6: memref<1x32xf32, #tpu.memory_space<vmem>>, %arg7: memref<1x32xf32, #tpu.memory_space<vmem>>, %arg8: memref<16x32xf32, #tpu.memory_space<vmem>>, %arg9: memref<16x32xf32, #tpu.memory_space<vmem>>, %arg10: memref<16x32xf32, #tpu.memory_space<vmem>>) attributes {dimension_semantics = [#tpu.dimension_semantics<parallel>], iteration_bounds = array<i64: 1>, scalar_prefetch = 0 : i64, scratch_operands = 0 : i64, tpu.core_type = #tpu.core_type<tc>, window_params = [{transform_indices = @transform_0, window_bounds = array<i64: 16, 32>}, {pipeline_mode = #tpu.pipeline_mode<synchronous>, transform_indices = @transform_1, window_bounds = array<i64: 32, 32>}, {pipeline_mode = #tpu.pipeline_mode<synchronous>, transform_indices = @transform_2, window_bounds = array<i64: 32, 32>}, {pipeline_mode = #tpu.pipeline_mode<synchronous>, transform_indices = @transform_3, window_bounds = array<i64: 32, 32>}, {pipeline_mode = #tpu.pipeline_mode<synchronous>, transform_indices = @transform_4, window_bounds = array<i64: 1, 32>}, {pipeline_mode = #tpu.pipeline_mode<synchronous>, transform_indices = @transform_5, window_bounds = array<i64: 1, 32>}, {pipeline_mode = #tpu.pipeline_mode<synchronous>, transform_indices = @transform_6, window_bounds = array<i64: 1, 32>}, {transform_indices = @transform_7, window_bounds = array<i64: 16, 32>}, {transform_indices = @transform_8, window_bounds = array<i64: 16, 32>}, {transform_indices = @transform_9, window_bounds = array<i64: 16, 32>}]} {
    %c0 = arith.constant 0 : index
    %c0_0 = arith.constant 0 : index
    %0 = vector.load %arg1[%c0, %c0_0] : memref<16x32xf32, #tpu.memory_space<vmem>>, vector<16x32xf32>
    %c0_1 = arith.constant 0 : index
    %c0_2 = arith.constant 0 : index
    %1 = vector.load %arg2[%c0_1, %c0_2] : memref<32x32xf32, #tpu.memory_space<vmem>>, vector<32x32xf32>
    %cst = arith.constant dense<0.000000e+00> : vector<16x32xf32>
    %2 = tpu.matmul %0, %1, %cst {dimension_numbers = #tpu.dot_dimension_numbers<[1], [0], [0], [1], [0, 0, 1, 1], [], []>} : vector<16x32xf32>, vector<32x32xf32>, vector<16x32xf32> -> vector<16x32xf32>
    %c0_3 = arith.constant 0 : index
    %c0_4 = arith.constant 0 : index
    %3 = vector.load %arg5[%c0_3, %c0_4] : memref<1x32xf32, #tpu.memory_space<vmem>>, vector<1x32xf32>
    %4 = vector.broadcast %3 : vector<1x32xf32> to vector<16x32xf32>
    %5 = arith.addf %2, %4 : vector<16x32xf32>
    %c0_5 = arith.constant 0 : index
    %c0_6 = arith.constant 0 : index
    %6 = vector.load %arg3[%c0_5, %c0_6] : memref<32x32xf32, #tpu.memory_space<vmem>>, vector<32x32xf32>
    %cst_7 = arith.constant dense<0.000000e+00> : vector<16x32xf32>
    %7 = tpu.matmul %0, %6, %cst_7 {dimension_numbers = #tpu.dot_dimension_numbers<[1], [0], [0], [1], [0, 0, 1, 1], [], []>} : vector<16x32xf32>, vector<32x32xf32>, vector<16x32xf32> -> vector<16x32xf32>
    %c0_8 = arith.constant 0 : index
    %c0_9 = arith.constant 0 : index
    %8 = vector.load %arg6[%c0_8, %c0_9] : memref<1x32xf32, #tpu.memory_space<vmem>>, vector<1x32xf32>
    %9 = vector.broadcast %8 : vector<1x32xf32> to vector<16x32xf32>
    %10 = arith.addf %7, %9 : vector<16x32xf32>
    %c0_10 = arith.constant 0 : index
    %c0_11 = arith.constant 0 : index
    %11 = vector.load %arg4[%c0_10, %c0_11] : memref<32x32xf32, #tpu.memory_space<vmem>>, vector<32x32xf32>
    %cst_12 = arith.constant dense<0.000000e+00> : vector<16x32xf32>
    %12 = tpu.matmul %0, %11, %cst_12 {dimension_numbers = #tpu.dot_dimension_numbers<[1], [0], [0], [1], [0, 0, 1, 1], [], []>} : vector<16x32xf32>, vector<32x32xf32>, vector<16x32xf32> -> vector<16x32xf32>
    %c0_13 = arith.constant 0 : index
    %c0_14 = arith.constant 0 : index
    %13 = vector.load %arg7[%c0_13, %c0_14] : memref<1x32xf32, #tpu.memory_space<vmem>>, vector<1x32xf32>
    %14 = vector.broadcast %13 : vector<1x32xf32> to vector<16x32xf32>
    %15 = arith.addf %12, %14 : vector<16x32xf32>
    %c0_15 = arith.constant 0 : index
    %c0_16 = arith.constant 0 : index
    %16 = vector.load %arg8[%c0_15, %c0_16] : memref<16x32xf32, #tpu.memory_space<vmem>>, vector<16x32xf32>
    tpu.vector_store %arg8[%c0_15, %c0_16], %5 {strides = array<i32>} : memref<16x32xf32, #tpu.memory_space<vmem>>, vector<16x32xf32>,
    %c0_17 = arith.constant 0 : index
    %c0_18 = arith.constant 0 : index
    %17 = vector.load %arg9[%c0_17, %c0_18] : memref<16x32xf32, #tpu.memory_space<vmem>>, vector<16x32xf32>
    tpu.vector_store %arg9[%c0_17, %c0_18], %10 {strides = array<i32>} : memref<16x32xf32, #tpu.memory_space<vmem>>, vector<16x32xf32>,
    %c0_19 = arith.constant 0 : index
    %c0_20 = arith.constant 0 : index
    %18 = vector.load %arg10[%c0_19, %c0_20] : memref<16x32xf32, #tpu.memory_space<vmem>>, vector<16x32xf32>
    tpu.vector_store %arg10[%c0_19, %c0_20], %15 {strides = array<i32>} : memref<16x32xf32, #tpu.memory_space<vmem>>, vector<16x32xf32>,
    return
  }
  func.func @transform_0(%arg0: i32) -> (i32, i32) {
    %c0_i32 = arith.constant 0 : i32
    %c0_i32_0 = arith.constant 0 : i32
    return %arg0, %c0_i32 : i32, i32
  }
  func.func @transform_1(%arg0: i32) -> (i32, i32) {
    %c0_i32 = arith.constant 0 : i32
    %c0_i32_0 = arith.constant 0 : i32
    %c0_i32_1 = arith.constant 0 : i32
    return %c0_i32, %c0_i32_0 : i32, i32
  }
  func.func @transform_2(%arg0: i32) -> (i32, i32) {
    %c0_i32 = arith.constant 0 : i32
    %c0_i32_0 = arith.constant 0 : i32
    %c0_i32_1 = arith.constant 0 : i32
    return %c0_i32, %c0_i32_0 : i32, i32
  }
  func.func @transform_3(%arg0: i32) -> (i32, i32) {
    %c0_i32 = arith.constant 0 : i32
    %c0_i32_0 = arith.constant 0 : i32
    %c0_i32_1 = arith.constant 0 : i32
    return %c0_i32, %c0_i32_0 : i32, i32
  }
  func.func @transform_4(%arg0: i32) -> (i32, i32) {
    %c0_i32 = arith.constant 0 : i32
    %c0_i32_0 = arith.constant 0 : i32
    %c0_i32_1 = arith.constant 0 : i32
    return %c0_i32, %c0_i32_0 : i32, i32
  }
  func.func @transform_5(%arg0: i32) -> (i32, i32) {
    %c0_i32 = arith.constant 0 : i32
    %c0_i32_0 = arith.constant 0 : i32
    %c0_i32_1 = arith.constant 0 : i32
    return %c0_i32, %c0_i32_0 : i32, i32
  }
  func.func @transform_6(%arg0: i32) -> (i32, i32) {
    %c0_i32 = arith.constant 0 : i32
    %c0_i32_0 = arith.constant 0 : i32
    %c0_i32_1 = arith.constant 0 : i32
    return %c0_i32, %c0_i32_0 : i32, i32
  }
  func.func @transform_7(%arg0: i32) -> (i32, i32) {
    %c0_i32 = arith.constant 0 : i32
    %c0_i32_0 = arith.constant 0 : i32
    return %arg0, %c0_i32 : i32, i32
  }
  func.func @transform_8(%arg0: i32) -> (i32, i32) {
    %c0_i32 = arith.constant 0 : i32
    %c0_i32_0 = arith.constant 0 : i32
    return %arg0, %c0_i32 : i32, i32
  }
  func.func @transform_9(%arg0: i32) -> (i32, i32) {
    %c0_i32 = arith.constant 0 : i32
    %c0_i32_0 = arith.constant 0 : i32
    return %arg0, %c0_i32 : i32, i32
  }
}

</mosaic_0001>

<bundles_post_ra>
// kernel: tpu_custom_call.1
= control target key start
LH: loop header
LB: loop body
LE: loop exit
PB: predicated region body
PF: predicated region fallthrough
CT: control target
= control target key end

     0   :  { %15 = vsyncpa [#allocation3], 0  ;;  %s872_s0 = inlined_call_operand.hbm [shape: f32[16,32], index: 0, kind: input, shape index: {}]   ;;  %s873_s1 = inlined_call_operand.hbm [shape: f32[32,32], index: 1, kind: input, shape index: {}]   ;;  %s874_s2 = inlined_call_operand.hbm [shape: f32[32,32], index: 2, kind: input, shape index: {}]   ;;  %s875_s3 = inlined_call_operand.hbm [shape: f32[32,32], index: 3, kind: input, shape index: {}]   ;;  %s876_s4 = inlined_call_operand.vmem [shape: f32[1,32], index: 4, kind: input, shape index: {}]   ;;  %s877_s5 = inlined_call_operand.vmem [shape: f32[1,32], index: 5, kind: input, shape index: {}]   ;;  %s878_s6 = inlined_call_operand.vmem [shape: f32[1,32], index: 6, kind: input, shape index: {}]   ;;  %s879_s7 = inlined_call_operand.hbm [shape: f32[16,32], index: 7, kind: output, shape index: {0}]   ;;  %s880_s8 = inlined_call_operand.hbm [shape: f32[16,32], index: 8, kind: output, shape index: {1}]   ;;  %s881_s9 = inlined_call_operand.hbm [shape: f32[16,32], index: 9, kind: output, shape index: {2}]  }
   0x1   :  { %16 = vsyncpa [#allocation6], 0 }
   0x2   :  { %17 = vsyncpa [#allocation9], 0 }
   0x3   :  { %18 = vsyncpa [#allocation4], 0 }
   0x4   :  { %19 = vsyncpa [#allocation12], 0  ;;  %s666_s30 = smov [#allocation5]   ;;  %s667_s11 = smov [#allocation2]  }
   0x5   :  { %s37_s10 = sshll.u32 %s666_s30, 4  ;;  %s25_s12 = sshll.u32 %s667_s11, 4  ;;  %s38_s10 = int_to_ptr.vmem [resolvable:$true] %s37_s10  ;;  %s725_s12 = int_to_ptr.vmem [resolvable:$true] %s25_s12 }
   0x6   :  { %s502_s15 = scalar_lea.hbm %s873_s1, 512 }
   0x7   :  { %p503_p0 = scmp.ne.s32.totalorder %s873_s1, %s502_s15  ;;  %p506_p1 = scmp.lt.u32.totalorder %s502_s15, %s873_s1 }
   0x9   :  { %p508_p2 = pnand %p506_p1, %p503_p0 }
   0xb   :  { %511 = shalt.err (!%p508_p2)
}
   0xc   :  { %s512_s20 = scalar_lea.vmem %s38_s10, 512  ;;  %p517_p4 = scmp.lt.s32.totalorder %s38_s10, %s38_s10 }
   0xd   :  { %p513_p3 = scmp.ne.s32.totalorder %s38_s10, %s512_s20  ;;  %p518_p5 = scmp.lt.s32.totalorder %s512_s20, %s512_s20 }
   0xf   :  { %p519_p6 = por %p518_p5, %p517_p4 }
  0x11   :  { %p520_p7 = pnand %p519_p6, %p513_p3 }
  0x13   :  { %523 = shalt.err (!%p520_p7)
}
  0x14   :  { %s668_s21 = smov 128   ;;  %s669_s22 = smov 8  }
  0x15   :  { %43 = dma.hbm_to_vmem [thread:$0]  %s873_s1, 512, %s38_s10, [#allocation6], %s668_s21, %s668_s21, %s669_s22  }
  0x16   :  { %s524_s27 = scalar_lea.hbm %s872_s0, 256 }
  0x17   :  { %p525_p8 = scmp.ne.s32.totalorder %s872_s0, %s524_s27  ;;  %p528_p9 = scmp.lt.u32.totalorder %s524_s27, %s872_s0 }
  0x19   :  { %p530_p10 = pnand %p528_p9, %p525_p8 }
  0x1b   :  { %533 = shalt.err (!%p530_p10)
}
  0x1c   :  { %s534_s13 = scalar_lea.vmem %s725_s12, 256  ;;  %p539_p12 = scmp.lt.s32.totalorder %s725_s12, %s725_s12 }
  0x1d   :  { %p535_p11 = scmp.ne.s32.totalorder %s725_s12, %s534_s13  ;;  %p540_p13 = scmp.lt.s32.totalorder %s534_s13, %s534_s13 }
  0x1f   :  { %p541_p0 = por %p540_p13, %p539_p12 }
  0x21   :  { %p542_p1 = pnand %p541_p0, %p535_p11 }
  0x23   :  { %545 = shalt.err (!%p542_p1)
}
  0x24   :  { %31 = dma.hbm_to_vmem [thread:$0]  %s872_s0, 256, %s725_s12, [#allocation3], %s668_s21, %s668_s21, %s669_s22  }
  0x25   :  { %s670_s14 = smov [#allocation7]   ;;  %s671_s16 = smov [#allocation8]  }
  0x26   :  { %s49_s15 = sshll.u32 %s670_s14, 4  ;;  %s61_s17 = sshll.u32 %s671_s16, 4  ;;  %s50_s15 = int_to_ptr.vmem [resolvable:$true] %s49_s15  ;;  %s762_s17 = int_to_ptr.vmem [resolvable:$true] %s61_s17 }
  0x27   :  { %s546_s20 = scalar_lea.hbm %s874_s2, 512 }
  0x28   :  { %p547_p2 = scmp.ne.s32.totalorder %s874_s2, %s546_s20  ;;  %p550_p3 = scmp.lt.u32.totalorder %s546_s20, %s874_s2 }
  0x2a   :  { %p552_p4 = pnand %p550_p3, %p547_p2 }
  0x2c   :  { %555 = shalt.err (!%p552_p4)
}
  0x2d   :  { %s556_s0 = scalar_lea.vmem %s50_s15, 512  ;;  %p561_p6 = scmp.lt.s32.totalorder %s50_s15, %s50_s15 }
  0x2e   :  { %p557_p5 = scmp.ne.s32.totalorder %s50_s15, %s556_s0  ;;  %p562_p7 = scmp.lt.s32.totalorder %s556_s0, %s556_s0 }
  0x30   :  { %p563_p8 = por %p562_p7, %p561_p6 }
  0x32   :  { %p564_p9 = pnand %p563_p8, %p557_p5 }
  0x34   :  { %567 = shalt.err (!%p564_p9)
}
  0x35   :  { %55 = dma.hbm_to_vmem [thread:$0]  %s874_s2, 512, %s50_s15, [#allocation6], %s668_s21, %s668_s21, %s669_s22  }
  0x36   :  { %s568_s30 = scalar_lea.hbm %s875_s3, 512 }
  0x37   :  { %p569_p10 = scmp.ne.s32.totalorder %s875_s3, %s568_s30  ;;  %p572_p11 = scmp.lt.u32.totalorder %s568_s30, %s875_s3 }
  0x39   :  { %p574_p12 = pnand %p572_p11, %p569_p10 }
  0x3b   :  { %577 = shalt.err (!%p574_p12)
}
  0x3c   :  { %s578_s14 = scalar_lea.vmem %s762_s17, 512  ;;  %p583_p0 = scmp.lt.s32.totalorder %s762_s17, %s762_s17 }
  0x3d   :  { %p579_p13 = scmp.ne.s32.totalorder %s762_s17, %s578_s14  ;;  %p584_p1 = scmp.lt.s32.totalorder %s578_s14, %s578_s14 }
  0x3f   :  { %p585_p2 = por %p584_p1, %p583_p0 }
  0x41   :  { %p586_p3 = pnand %p585_p2, %p579_p13 }
  0x43   :  { %589 = shalt.err (!%p586_p3)
}
  0x44   :  { %67 = dma.hbm_to_vmem [thread:$0]  %s875_s3, 512, %s762_s17, [#allocation9], %s668_s21, %s668_s21, %s669_s22  }
  0x45   :  { %656 = dma.done.wait [#allocation3], 256  }
  0x46   :  { %657 = vsyncadd [#allocation3], 4294967040 }
  0x47   :  { %658 = dma.done.wait [#allocation6], 1024  }
  0x48   :  { %659 = vsyncadd [#allocation6], 4294966272 }
  0x49   :  { %660 = dma.done.wait [#allocation9], 512  }
  0x4a   :  { %661 = vsyncadd [#allocation9], 4294966784  ;;  %v88_v0 = vld [vmem:[#allocation5] sm:$0xff]  ;;  %v89_v1 = vld [vmem:[#allocation5 + $0x8] sm:$0xff]  ;;  %vm99_vm0 = vcmask 261120   ;;  %s672_s19 = smov [#allocation10]  }
  0x4b   :  { %v90_v2 = vld [vmem:[#allocation5 + $0x10] sm:$0xff]  ;;  %v469_v3 = vpack.c.bf16 %v89_v1, %v88_v0  ;;  %v91_v4 = vld [vmem:[#allocation5 + $0x18] sm:$0xff]  ;;  %v181_v5 = vld [vmem:[#allocation7] sm:$0xff]  ;;  %s364_s20 = sshll.u32 %s672_s19, 4  ;;  %s673_s23 = smov [#allocation11]   ;;  %s365_s20 = int_to_ptr.vmem [resolvable:$true] %s364_s20 }
  0x4c   :  { %v182_v6 = vld [vmem:[#allocation7 + $0x8] sm:$0xff]  ;;  %v473_v7 = vpack.c.bf16 %v91_v4, %v90_v2  ;;  %v86_v9 = vld [vmem:[#allocation2] sm:$0xff]  ;;  %v267_v10 = vld [vmem:[#allocation8] sm:$0xff]  ;;  %s376_s24 = sshll.u32 %s673_s23, 4  ;;  %s590_s25 = scalar_lea.vmem %s365_s20, 256  ;;  %s812_s24 = int_to_ptr.vmem [resolvable:$true] %s376_s24 }
  0x4d   :  { %v477_v8 = vpack.c.bf16 %v182_v6, %v181_v5  ;;  %470 = vmatprep.subr.bf16.mxu0 %v469_v3  ;;  %444 = vmatprep.mubr.msk.f32.mxu0 %vm99_vm0, %v86_v9  ;;  %v268_v11 = vld [vmem:[#allocation8 + $0x8] sm:$0xff]  ;;  %v183_v12 = vld [vmem:[#allocation7 + $0x10] sm:$0xff]  ;;  %v184_v13 = vld [vmem:[#allocation7 + $0x18] sm:$0xff]  ;;  %p591_p4 = scmp.ne.s32.totalorder %s365_s20, %s590_s25  ;;  %p595_p5 = scmp.lt.s32.totalorder %s365_s20, %s365_s20 }
  0x4e   :  { %472 = vmatpush3.bf16.msra.mxu0 %v469_v3  ;;  %v481_v14 = vpack.c.bf16 %v184_v13, %v183_v12  ;;  %v485_v15 = vpack.c.bf16 %v268_v11, %v267_v10  ;;  %v269_v16 = vld [vmem:[#allocation8 + $0x10] sm:$0xff]  ;;  %v270_v17 = vld [vmem:[#allocation8 + $0x18] sm:$0xff]  ;;  %455 = vmatprep.mubr.msk.f32.mxu1 %vm99_vm0, %v86_v9  ;;  %p596_p6 = scmp.lt.s32.totalorder %s590_s25, %s590_s25 }
  0x4f   :  { %478 = vmatprep.subr.bf16.mxu1 %v477_v8  ;;  %474 = vmatprep.subr.bf16.mxu0 %v473_v7  ;;  %v87_v18 = vld [vmem:[#allocation2 + $0x8] sm:$0xff]  ;;  %v489_v19 = vpack.c.bf16 %v270_v17, %v269_v16  ;;  %v409_v20 = vld [vmem:[%s876_s4] ss:$0 sm:$0xff] }
  0x50   :  { %480 = vmatpush3.bf16.msra.mxu1 %v477_v8  ;;  %v412_v21 = vld [vmem:[%s877_s5] ss:$0 sm:$0xff]  ;;  %p597_p7 = por %p596_p6, %p595_p5 }
  0x51   :  { %482 = vmatprep.subr.bf16.mxu1 %v481_v14  ;;  %v415_v30 = vld [vmem:[%s878_s6] ss:$0 sm:$0xff] }
  0x52   :  { %476 = vmatpush3.bf16.msra.mxu0 %v473_v7  ;;  %p598_p8 = pnand %p597_p7, %p591_p4 }
  0x53   :  { %486 = vmatprep.subr.bf16.mxu0 %v485_v15 }
  0x54   :  { %484 = vmatpush3.bf16.msra.mxu1 %v481_v14 }
  0x55   :  { %445 = vmatmul.mubr.msk.f32.vlgmr.msra.gmra.mrb[0].mxu0 %vm99_vm0, %v87_v18 }
  0x56   :  { %488 = vmatpush3.bf16.msra.mxu0 %v485_v15  ;;  %466 = vmatprep.mubr.msk.f32.mxu0 %vm99_vm0, %v86_v9 }
  0x57   :  { %456 = vmatmul.mubr.msk.f32.vlgmr.msra.gmra.mrb[0].mxu1 %vm99_vm0, %v87_v18  ;;  %490 = vmatprep.subr.bf16.mxu0 %v489_v19 }
  0x5a   :  { %492 = vmatpush3.bf16.msra.mxu0 %v489_v19 }
  0x5d   :  { %467 = vmatmul.mubr.msk.f32.vlgmr.msra.gmra.mrb[2].mxu0 %vm99_vm0, %v87_v18 }
 0x128   :  { %v446_v22 = vpop.f32.mrb[0].mxu0 }
 0x129   :  { %v178_v23 = vadd.f32 %v446_v22, %v409_v20  ;;  %v172_v24 = vpop.f32.mrb[1].mxu0 }
 0x12a   :  { %v457_v25 = vpop.f32.mrb[0].mxu1  ;;  %v173_v26 = vadd.f32 %v409_v20, %v172_v24 }
 0x12b   :  { %v264_v27 = vadd.f32 %v457_v25, %v412_v21  ;;  %v258_v28 = vpop.f32.mrb[1].mxu1  ;;  %354 = vst.msk [vmem:[#allocation10 + $0x8] sm:$0xff] %vm99_vm0, %v178_v23 }
 0x12c   :  { %v259_v29 = vadd.f32 %v412_v21, %v258_v28  ;;  %353 = vst.msk [vmem:[#allocation10] sm:$0xff] %vm99_vm0, %v173_v26 }
 0x12d   :  { %356 = vst.msk [vmem:[#allocation11 + $0x8] sm:$0xff] %vm99_vm0, %v264_v27 }
 0x12e   :  { %355 = vst.msk [vmem:[#allocation11] sm:$0xff] %vm99_vm0, %v259_v29 }
 0x12f   :  { %601 = shalt.err (!%p598_p8)
}
 0x130   :  { %s602_s12 = scalar_lea.hbm %s879_s7, 256 }
 0x131   :  { %p603_p9 = scmp.ne.s32.totalorder %s879_s7, %s602_s12  ;;  %p606_p10 = scmp.lt.u32.totalorder %s602_s12, %s879_s7 }
 0x133   :  { %p608_p11 = pnand %p606_p10, %p603_p9 }
 0x135   :  { %611 = shalt.err (!%p608_p11)
}
 0x136   :  { %370 = dma.vmem_to_hbm [thread:$0]  %s365_s20, 256, %s879_s7, [#allocation4], %s668_s21, %s668_s21, %s669_s22  }
 0x137   :  { %s612_s13 = scalar_lea.vmem %s812_s24, 256  ;;  %p617_p13 = scmp.lt.s32.totalorder %s812_s24, %s812_s24 }
 0x138   :  { %p613_p12 = scmp.ne.s32.totalorder %s812_s24, %s612_s13  ;;  %p618_p0 = scmp.lt.s32.totalorder %s612_s13, %s612_s13 }
 0x13a   :  { %p619_p1 = por %p618_p0, %p617_p13 }
 0x13c   :  { %p620_p2 = pnand %p619_p1, %p613_p12 }
 0x13e   :  { %623 = shalt.err (!%p620_p2)
}
 0x13f   :  { %s624_s14 = scalar_lea.hbm %s880_s8, 256 }
 0x140   :  { %p625_p3 = scmp.ne.s32.totalorder %s880_s8, %s624_s14  ;;  %p628_p4 = scmp.lt.u32.totalorder %s624_s14, %s880_s8 }
 0x142   :  { %p630_p5 = pnand %p628_p4, %p625_p3 }
 0x144   :  { %633 = shalt.err (!%p630_p5)
}
 0x145   :  { %382 = dma.vmem_to_hbm [thread:$0]  %s812_s24, 256, %s880_s8, [#allocation12], %s668_s21, %s668_s21, %s669_s22   ;;  %v468_v31 = vpop.f32.mrb[2].mxu0 }
 0x146   :  { %s674_s18 = smov [#allocation13]   ;;  %v350_v32 = vadd.f32 %v468_v31, %v415_v30  ;;  %v344_v33 = vpop.f32.mrb[3].mxu0 }
 0x147   :  { %s388_s19 = sshll.u32 %s674_s18, 4  ;;  %v345_v34 = vadd.f32 %v415_v30, %v344_v33  ;;  %s389_s19 = int_to_ptr.vmem [resolvable:$true] %s388_s19 }
 0x148   :  { %358 = vst.msk [vmem:[#allocation13 + $0x8] sm:$0xff] %vm99_vm0, %v350_v32  ;;  %s634_s20 = scalar_lea.vmem %s389_s19, 256  ;;  %p639_p7 = scmp.lt.s32.totalorder %s389_s19, %s389_s19 }
 0x149   :  { %357 = vst.msk [vmem:[#allocation13] sm:$0xff] %vm99_vm0, %v345_v34  ;;  %p635_p6 = scmp.ne.s32.totalorder %s389_s19, %s634_s20  ;;  %p640_p8 = scmp.lt.s32.totalorder %s634_s20, %s634_s20 }
 0x14b   :  { %p641_p9 = por %p640_p8, %p639_p7 }
 0x14d   :  { %p642_p10 = pnand %p641_p9, %p635_p6 }
 0x14f   :  { %645 = shalt.err (!%p642_p10)
}
 0x150   :  { %s646_s24 = scalar_lea.hbm %s881_s9, 256 }
 0x151   :  { %p647_p11 = scmp.ne.s32.totalorder %s881_s9, %s646_s24  ;;  %p650_p12 = scmp.lt.u32.totalorder %s646_s24, %s881_s9 }
 0x153   :  { %p652_p13 = pnand %p650_p12, %p647_p11 }
 0x155   :  { %655 = shalt.err (!%p652_p13)
}
 0x156   :  { %394 = dma.vmem_to_hbm [thread:$0]  %s389_s19, 256, %s881_s9, [#allocation12], %s668_s21, %s668_s21, %s669_s22  }
 0x157   :  { %662 = dma.done.wait [#allocation4], 256  }
 0x158   :  { %663 = vsyncadd [#allocation4], 4294967040 }
 0x159   :  { %664 = dma.done.wait [#allocation12], 512  }
 0x15a   :  { %665 = vsyncadd [#allocation12], 4294966784 }
 0x15b   :  { %404 = vsyncpa [#allocation3], 1 }
 0x15c   :  { %405 = vsyncpa [#allocation6], 1 }
 0x15d   :  { %406 = vsyncpa [#allocation9], 1 }
 0x15e   :  { %407 = vsyncpa [#allocation4], 1 }
 0x15f   :  { %408 = vsyncpa [#allocation12], 1 }

</bundles_post_ra>
